<compile_context>
chip_gen: v7x
topology: tpu7x:2x2x1
jax: 0.10.0
libtpu: 0.0.40
codegen_flags: <defaults>
</compile_context>

<pallas_src>
import functools

import jax
import jax.numpy as jnp
from jax.experimental import pallas as pl
from jax.experimental.pallas import tpu as pltpu

_LANES = 128


def _mse_partial_kernel(p_ref, t_ref, o_ref, *, rows, block_rows, mask_tail):
    """Partial sum of squared differences for one (block_rows, 128) tile.

    p_ref, t_ref: (block_rows, 128) VMEM tiles of the flattened inputs.
    o_ref:        (1, 1, 128) lane-dense partial sums for this grid step.
    """
    # Upcast only for accumulation (no-op for f32; narrow inputs still travel
    # HBM->VMEM at their native width).
    d = p_ref[...].astype(jnp.float32) - t_ref[...].astype(jnp.float32)
    sq = d * d
    if mask_tail:
        # rows is not a multiple of block_rows: the last block's trailing rows
        # are an out-of-bounds (unspecified-content) read -- zero them out.
        row_ids = (pl.program_id(0) * block_rows
                   + jax.lax.broadcasted_iota(jnp.int32, sq.shape, 0))
        sq = jnp.where(row_ids < rows, sq, 0.0)
    # Reduce along sublanes only; keep all 128 lanes so the store is an
    # unmasked full-lane write.  Cross-lane reduce happens once, in JAX.
    o_ref[...] = jnp.sum(sq, axis=0, keepdims=True).reshape(1, 1, _LANES)


def adversarial_loss(prediction: jax.Array, target: jax.Array, *,
                     block_rows: int = 4096,
                     min_kernel_elems: int = 1 << 20) -> jax.Array:
    """MSE loss (mean reduction) between prediction and target, any shape."""
    assert prediction.shape == target.shape, (prediction.shape, target.shape)
    out_dtype = jnp.result_type(prediction.dtype, target.dtype)
    n = prediction.size

    # Small-input fast path: kernel launch + partial-reduce epilogue dominate
    # below ~MB scale; plain XLA is faster there.
    if n < min_kernel_elems:
        d = prediction.astype(jnp.float32) - target.astype(jnp.float32)
        return jnp.mean(d * d).astype(out_dtype)

    # Lane-dense (rows, 128) view of the flattened inputs.
    if n % _LANES == 0:
        rows = n // _LANES
        p2 = prediction.reshape(rows, _LANES)        # layout-preserving bitcast
        t2 = target.reshape(rows, _LANES)
    else:
        rows = -(-n // _LANES)                       # ceil(n / 128)
        pad = rows * _LANES - n
        # Ragged lane tail only: zero pad (0 - 0)^2 contributes nothing.
        p2 = jnp.pad(prediction.reshape(-1), (0, pad)).reshape(rows, _LANES)
        t2 = jnp.pad(target.reshape(-1), (0, pad)).reshape(rows, _LANES)

    # Sublane packing granularity for the input dtype (f32: 8, bf16: 16, i8: 32).
    itemsize = prediction.dtype.itemsize
    sub = {4: 8, 2: 16, 1: 32}.get(itemsize, 8)

    if rows <= sub:
        br = rows                                    # block == full dim (legal)
    else:
        br = max(sub, (min(block_rows, rows) // sub) * sub)
        if rows >= 2 * sub:
            # Keep at least two grid steps so the "parallel" axis can shard
            # across the two TensorCores on v7x.
            ceil_half = -(-rows // 2)
            half = -(-ceil_half // sub) * sub
            br = min(br, half)

    num_blocks = -(-rows // br)
    mask_tail = (rows % br) != 0

    kernel = functools.partial(_mse_partial_kernel,
                               rows=rows, block_rows=br, mask_tail=mask_tail)

    # Double-buffered input footprint; raise scoped VMEM only when needed.
    in_bytes = prediction.dtype.itemsize + target.dtype.itemsize
    buf_bytes = 2 * br * _LANES * in_bytes
    compiler_kwargs = dict(dimension_semantics=("parallel",))
    if buf_bytes > 12 * 1024 * 1024:
        compiler_kwargs["vmem_limit_bytes"] = min(buf_bytes + (8 << 20), 100 << 20)

    partials = pl.pallas_call(
        kernel,
        out_shape=jax.ShapeDtypeStruct((num_blocks, 1, _LANES), jnp.float32),
        grid_spec=pltpu.PrefetchScalarGridSpec(
            num_scalar_prefetch=0,
            grid=(num_blocks,),
            in_specs=[
                pl.BlockSpec((br, _LANES), lambda i: (i, 0)),
                pl.BlockSpec((br, _LANES), lambda i: (i, 0)),
            ],
            out_specs=pl.BlockSpec((1, 1, _LANES), lambda i: (i, 0, 0)),
        ),
        compiler_params=pltpu.CompilerParams(**compiler_kwargs),
        cost_estimate=pl.CostEstimate(
            flops=3 * n,
            transcendentals=0,
            bytes_accessed=n * in_bytes + num_blocks * _LANES * 4,
        ),
    )(p2, t2)

    loss = jnp.sum(partials) / n
    # Match torch.nn.MSELoss dtype behaviour (loss in the inputs' dtype).
    return loss.astype(out_dtype)


def _reference_loss(prediction, target):
    """Pure-JAX reference of the PyTorch module (for sanity checking)."""
    out_dtype = jnp.result_type(prediction.dtype, target.dtype)
    d = prediction.astype(jnp.float32) - target.astype(jnp.float32)
    return jnp.mean(d * d).astype(out_dtype)


if __name__ == "__main__":
    key = jax.random.PRNGKey(0)

    def check(shape, dtype, *, atol, rtol, **kwargs):
        k1, k2 = jax.random.split(jax.random.fold_in(key, hash(shape) & 0xFFFF))
        p = jax.random.normal(k1, shape, dtype=jnp.float32).astype(dtype)
        t = jax.random.normal(k2, shape, dtype=jnp.float32).astype(dtype)
        got = jax.block_until_ready(adversarial_loss(p, t, **kwargs))
        ref = jax.block_until_ready(_reference_loss(p, t))
        assert jnp.allclose(got.astype(jnp.float32), ref.astype(jnp.float32),
                            rtol=rtol, atol=atol), (shape, dtype, got, ref)

    # 1) Spec-sized input, forced through the Pallas kernel (grid of 2 blocks).
    check((2, 4, 16, 16), jnp.float32, atol=1e-6, rtol=1e-5,
          min_kernel_elems=0)
    # 2) Same input through the default small-input fast path.
    check((2, 4, 16, 16), jnp.float32, atol=1e-6, rtol=1e-5)
    # 3) Ragged lane tail (n % 128 != 0) through the kernel.
    check((3, 5, 7), jnp.float32, atol=1e-6, rtol=1e-5, min_kernel_elems=0)
    # 4) Partial last block (rows % block_rows != 0) -> exercises the row mask.
    check((5, 8, 128), jnp.float32, atol=1e-6, rtol=1e-5,
          block_rows=16, min_kernel_elems=0)
    # 5) bf16 inputs (16-row sublane packing path).
    check((4, 16, 128), jnp.bfloat16, atol=1e-2, rtol=1e-2,
          block_rows=32, min_kernel_elems=0)

    print("KERNEL_OK")
</pallas_src>

<mosaic_0001>
module attributes {stable_mosaic.version = 11 : i64} {
  func.func @_mse_partial_kernel(%arg0: i32, %arg1: memref<8x128xf32, #tpu.memory_space<vmem>>, %arg2: memref<8x128xf32, #tpu.memory_space<vmem>>, %arg3: memref<1x1x128xf32, #tpu.memory_space<vmem>>) attributes {dimension_semantics = [#tpu.dimension_semantics<parallel>], iteration_bounds = array<i64: 2>, scalar_prefetch = 0 : i64, scratch_operands = 0 : i64, tpu.core_type = #tpu.core_type<tc>, window_params = [{transform_indices = @transform_0, window_bounds = array<i64: 8, 128>}, {transform_indices = @transform_1, window_bounds = array<i64: 8, 128>}, {transform_indices = @transform_2, window_bounds = array<i64: 1, 1, 128>}]} {
    %c0 = arith.constant 0 : index
    %c0_0 = arith.constant 0 : index
    %0 = vector.load %arg1[%c0, %c0_0] : memref<8x128xf32, #tpu.memory_space<vmem>>, vector<8x128xf32>
    %c0_1 = arith.constant 0 : index
    %c0_2 = arith.constant 0 : index
    %1 = vector.load %arg2[%c0_1, %c0_2] : memref<8x128xf32, #tpu.memory_space<vmem>>, vector<8x128xf32>
    %2 = arith.subf %0, %1 : vector<8x128xf32>
    %3 = arith.mulf %2, %2 : vector<8x128xf32>
    %cst = arith.constant dense<0.000000e+00> : vector<128xf32>
    %4 = vector.multi_reduction <add>, %3, %cst [0] : vector<8x128xf32> to vector<128xf32>
    %5 = vector.shape_cast %4 : vector<128xf32> to vector<1x128xf32>
    %6 = vector.shape_cast %5 : vector<1x128xf32> to vector<1x1x128xf32>
    %c0_3 = arith.constant 0 : index
    %c0_4 = arith.constant 0 : index
    %c0_5 = arith.constant 0 : index
    %7 = vector.load %arg3[%c0_3, %c0_4, %c0_5] : memref<1x1x128xf32, #tpu.memory_space<vmem>>, vector<1x1x128xf32>
    tpu.vector_store %arg3[%c0_3, %c0_4, %c0_5], %6 {strides = array<i32>} : memref<1x1x128xf32, #tpu.memory_space<vmem>>, vector<1x1x128xf32>,
    return
  }
  func.func @transform_0(%arg0: i32) -> (i32, i32) {
    %c0_i32 = arith.constant 0 : i32
    %c0_i32_0 = arith.constant 0 : i32
    return %arg0, %c0_i32 : i32, i32
  }
  func.func @transform_1(%arg0: i32) -> (i32, i32) {
    %c0_i32 = arith.constant 0 : i32
    %c0_i32_0 = arith.constant 0 : i32
    return %arg0, %c0_i32 : i32, i32
  }
  func.func @transform_2(%arg0: i32) -> (i32, i32, i32) {
    %c0_i32 = arith.constant 0 : i32
    %c0_i32_0 = arith.constant 0 : i32
    %c0_i32_1 = arith.constant 0 : i32
    return %arg0, %c0_i32, %c0_i32_0 : i32, i32, i32
  }
}

</mosaic_0001>

<bundles_post_ra>
// kernel: tpu_custom_call.1
= control target key start
LH: loop header
LB: loop body
LE: loop exit
PB: predicated region body
PF: predicated region fallthrough
CT: control target
= control target key end

     0   :  { %7 = vsyncpa [#allocation3], 0  ;;  %s732_s0 = inlined_call_operand.hbm [shape: f32[16,128], index: 0, kind: input, shape index: {}]   ;;  %s733_s1 = inlined_call_operand.hbm [shape: f32[16,128], index: 1, kind: input, shape index: {}]   ;;  %s734_s2 = inlined_call_operand.hbm [shape: f32[2,1,128], index: 2, kind: output, shape index: {}]  }
   0x1   :  { %9 = vsyncpa [#allocation3 + $0x1], 0 }
   0x2   :  { %10 = vsyncpa [#allocation6], 0 }
   0x3   :  { %12 = vsyncpa [#allocation6 + $0x1], 0 }
   0x4   :  { %13 = vsyncpa [#allocation4], 0 }
   0x5   :  { %15 = vsyncpa [#allocation4 + $0x1], 0  ;;  %s522_s9 = smov 0   ;;  %s524_s10 = smov 0  }
   0x6   :  { %s526_s11 = smov 0   ;;  %s528_s12 = smov 0  }
   0x7 LB: > { %s543_s13 = sadd.s32 4294967295, %s502_s12   ;;  %s308_s14 = sadd.s32 4294967294, %s502_s12   ;;  %s502_s12 = sphi %s528_s12, %s753_s12   ;;  %s498_s11 = sphi %s526_s11, %s752_s11   ;;  %s494_s10 = sphi %s524_s10, %s751_s10   ;;  %s490_s9 = sphi %s522_s9, %s750_s9  }
   0x8   : > { %s547_s15 = sadd.s32 1, %s502_s12   ;;  %s28_s16 = sadd.s32 1, %s498_s11 }
   0x9   : > { %s25_s17 = ssub.s32 %s502_s12, %s547_s15  ;;  %p35_p0 = scmp.ne.s32.totalorder %s498_s11, %s494_s10 }
   0xa   : > { %p26_p1 = scmp.eq.s32.totalorder %s25_s17, 0  ;;  %p36_p2 = scmp.eq.s32.totalorder %s502_s12, 0 }
   0xb   : > { %p41_p3 = scmp.ne.s32.totalorder %s494_s10, %s490_s9  ;;  %p42_p4 = scmp.eq.s32.totalorder %s543_s13, 0 }
   0xc   : > { %s559_s18 = scalar_select %p26_p1, %s498_s11, %s28_s16  }
   0xd   : > { %p561_p5 = por %p36_p2, %p35_p0  ;;  %p565_p6 = por %p42_p4, %p41_p3 }
   0xe   : > { %p91_p7 = scmp.eq.s32.totalorder %s543_s13, 1  ;;  %p97_p8 = scmp.eq.s32.totalorder %s308_s14, 1 }
   0xf   : > { %s738_s20 = scalar_select %p565_p6, 1, 0 }
  0x10   : > { %p338_p10 = scmp.lt.s32.totalorder %s502_s12, 2  ;;  %p572_p11 = por %p91_p7, %p35_p0 }
  0x11   : > { %p576_p12 = por %p97_p8, %p41_p3  ;;  %s581_s23 = sand.u32 1, %s498_s11  }
  0x12   : > { %s739_s21 = scalar_select %p572_p11, 1, 0 }
  0x13   : > { %s740_s22 = scalar_select %p576_p12, 1, 0 }
  0x14   : > { %s312_s24 = sshll.u32 %s502_s12, 7  ;;  %s311_s25 = sshll.u32 %s581_s23, 3 }
  0x15   : > { %s590_s28 = scalar_lea.hbm %s732_s0, %s312_s24  ;;  %s121_s29 = scalar_lea.vmem [#allocation2], %s311_s25 }
  0x16   : > { %s128_s30 = sshll.u32 %s121_s29, 4  ;;  %p596_p13 = pnand %p338_p10, %p561_p5  ;;  %s600_s30 = int_to_ptr.vmem [resolvable:$true] %s128_s30 }
  0x17   : > { %s118_s4 = scalar_lea.sflag [#allocation3], %s581_s23  ;;  %s372_s5 = scalar_lea.hbm %s590_s28, 128 }
  0x18   : > { %p373_p2 = scmp.ne.s32.totalorder %s590_s28, %s372_s5  ;;  %p374_p3 = pneg %p596_p13 }
  0x19   : > { %s377_s8 = scalar_lea.hbm %s732_s0, 256  ;;  %p378_p5 = scmp.lt.u32.totalorder %s590_s28, %s732_s0 }
  0x1a   : > { %p375_p4 = pnand %p374_p3, %p373_p2  ;;  %p379_p8 = scmp.lt.u32.totalorder %s377_s8, %s372_s5 }
  0x1b   : > { %p381_p9 = scmp.lt.u32.totalorder %s372_s5, %s590_s28 }
  0x1c   : > { %p376_p7 = pneg %p375_p4  ;;  %p380_p10 = por %p379_p8, %p378_p5 }
  0x1e   : > { %p382_p0 = por %p381_p9, %p380_p10 }
  0x20   : > { %p383_p1 = pnand %p382_p0, %p376_p7 }
  0x22   : > { %386 = shalt.err (!%p383_p1)
}
  0x23   : > { %s387_s17 = scalar_lea.vmem %s600_s30, 128  ;;  %s504_s19 = smov [#allocation2]  }
  0x24   : > { %p388_p2 = scmp.ne.s32.totalorder %s600_s30, %s387_s17  ;;  %s392_s26 = sshll.u32 %s504_s19, 4  ;;  %s393_s26 = int_to_ptr.vmem [resolvable:$false] %s392_s26 }
  0x25   : > { %s394_s27 = scalar_lea.vmem %s393_s26, 256  ;;  %p395_p11 = scmp.lt.s32.totalorder %s600_s30, %s393_s26 }
  0x26   : > { %p390_p4 = pnand %p388_p2, %p374_p3  ;;  %p396_p5 = scmp.lt.s32.totalorder %s394_s27, %s387_s17 }
  0x28   : > { %p391_p12 = pneg %p390_p4  ;;  %p397_p8 = por %p396_p5, %p395_p11 }
  0x2a   : > { %p398_p9 = pnand %p397_p8, %p391_p12 }
  0x2c   : > { %401 = shalt.err (!%p398_p9)
}
  0x2d   : > { %330 = dma.hbm_to_vmem [thread:$0]  (!%p596_p13), %s590_s28, 128, %s600_s30, %s118_s4  }
  0x2e   : > { %p742_p0 = scmp.lt.s32.totalorder %s502_s12, 3  ;;  %p743_p1 = scmp.ge.s32.totalorder %s502_s12, 1 }
  0x2f   : > { %s643_s7 = scalar_lea.hbm %s733_s1, %s312_s24  ;;  %s139_s8 = scalar_lea.vmem [#allocation5], %s311_s25 }
  0x30   : > { %p634_p7 = pnand %p743_p1, %p742_p0  ;;  %s146_s14 = sshll.u32 %s139_s8, 4  ;;  %s147_s14 = int_to_ptr.vmem [resolvable:$true] %s146_s14 }
  0x31   : > { %s136_s28 = scalar_lea.sflag [#allocation6], %s581_s23  ;;  %s402_s30 = scalar_lea.hbm %s643_s7, 128 }
  0x32   : > { %s744_s29 = scalar_select %p634_p7, 1, 0 }
  0x33   : > { %p403_p11 = scmp.ne.s32.totalorder %s643_s7, %s402_s30  ;;  %s407_s24 = scalar_lea.hbm %s733_s1, 256 }
  0x34   : > { %p408_p2 = scmp.lt.u32.totalorder %s643_s7, %s733_s1  ;;  %p409_p4 = scmp.lt.u32.totalorder %s407_s24, %s402_s30 }
  0x35   : > { %p405_p12 = pnand %p403_p11, %p374_p3  ;;  %p411_p8 = scmp.lt.u32.totalorder %s402_s30, %s643_s7 }
  0x36   : > { %p410_p5 = por %p409_p4, %p408_p2 }
  0x37   : > { %p406_p10 = pneg %p405_p12 }
  0x38   : > { %p412_p9 = por %p411_p8, %p410_p5 }
  0x3a   : > { %p413_p0 = pnand %p412_p9, %p406_p10 }
  0x3c   : > { %416 = shalt.err (!%p413_p0)
}
  0x3d   : > { %s417_s23 = scalar_lea.vmem %s147_s14, 128  ;;  %s505_s25 = smov [#allocation5]  }
  0x3e   : > { %p418_p1 = scmp.ne.s32.totalorder %s147_s14, %s417_s23  ;;  %s422_s26 = sshll.u32 %s505_s25, 4  ;;  %s423_s26 = int_to_ptr.vmem [resolvable:$false] %s422_s26 }
  0x3f   : > { %s424_s27 = scalar_lea.vmem %s423_s26, 256  ;;  %p425_p6 = scmp.lt.s32.totalorder %s147_s14, %s423_s26 }
  0x40   : > { %p420_p11 = pnand %p418_p1, %p374_p3  ;;  %p426_p7 = scmp.lt.s32.totalorder %s424_s27, %s417_s23 }
  0x42   : > { %p421_p12 = pneg %p420_p11  ;;  %p427_p2 = por %p426_p7, %p425_p6 }
  0x44   : > { %p428_p4 = pnand %p427_p2, %p421_p12 }
  0x46   : > { %431 = shalt.err (!%p428_p4)
}
  0x47   : > { %333 = dma.hbm_to_vmem [thread:$0]  (!%p596_p13), %s643_s7, 128, %s147_s14, %s136_s28  }
  0x48   : > { %p745_p10 = scmp.ne.s32.totalorder %s744_s29, 0 }
  0x49   : > { %s670_s5 = sand.u32 (!%p745_p10), 1, %s494_s10   ;;  %p746_p3 = scmp.ne.s32.totalorder (!%p745_p10), %s738_s20, 0 }
  0x4a   : > { %155 = sbr.rel (%p745_p10) target bundleno = 115 (0x73), region = 28  ;;  %s316_s6 = sshll.u32 (!%p745_p10), %s670_s5, 3 }
  0x4b   : > { %s158_s8 = scalar_lea.sflag (!%p745_p10), [#allocation3], %s670_s5  ;;  %s161_s30 = scalar_lea.vmem (!%p745_p10), [#allocation2], %s316_s6 }
  0x51   : > { %477 = dma.done.wait (%p746_p3), %s158_s8, 128  }
  0x52   : > { %479 = vsyncadd (%p746_p3), %s158_s8, 4294967168  ;;  %s167_s3 = scalar_lea.sflag [#allocation6], %s670_s5  ;;  %s170_s7 = scalar_lea.vmem [#allocation5], %s316_s6 }
  0x53   : > { %481 = dma.done.wait (%p746_p3), %s167_s3, 128  }
  0x54   : > { %483 = vsyncadd (%p746_p3), %s167_s3, 4294967168  ;;  %v195_v0 = vld [vmem:[%s161_s30] sm:$0xff]  ;;  %v196_v1 = vld [vmem:[%s170_s7] sm:$0xff]  ;;  %s194_s29 = scalar_lea.vmem [#allocation7], %s670_s5  ;;  %s318_s28 = sshll.u32 %s543_s13, 4 }
  0x55   : > { %v197_v2 = vsub.f32 %v195_v0, %v196_v1  ;;  %s219_s14 = sshll.u32 %s194_s29, 4  ;;  %s690_s16 = scalar_lea.hbm %s734_s2, %s318_s28  ;;  %s685_s14 = int_to_ptr.vmem [resolvable:$true] %s219_s14 }
  0x56   : > { %s207_s24 = scalar_lea.sflag [#allocation4], %s670_s5  ;;  %s432_s17 = scalar_lea.vmem %s685_s14, 16 }
  0x57   : > { %v198_v3 = vmul.f32 %v197_v2, %v197_v2  ;;  %p433_p6 = scmp.ne.s32.totalorder %s685_s14, %s432_s17  ;;  %p747_p13 = scmp.ne.s32.totalorder %s739_s21, 0 }
  0x58   : > { %s506_s13 = smov [#allocation7]  }
  0x59   : > { %v199_v4 = vrot.slane %v198_v3, 4  ;;  %p434_p7 = pnand %p433_p6, %p747_p13  ;;  %s436_s19 = sshll.u32 %s506_s13, 4  ;;  %s437_s19 = int_to_ptr.vmem [resolvable:$false] %s436_s19 }
  0x5a   : > { %s438_s23 = scalar_lea.vmem %s437_s19, 32  ;;  %p439_p8 = scmp.lt.s32.totalorder %s685_s14, %s437_s19 }
  0x5b   : > { %v200_v5 = vadd.f32 %v199_v4, %v198_v3  ;;  %p435_p5 = pneg %p434_p7  ;;  %p440_p9 = scmp.lt.s32.totalorder %s438_s23, %s432_s17 }
  0x5d   : > { %v201_v6 = vrot.slane %v200_v5, 2  ;;  %p441_p0 = por %p440_p9, %p439_p8 }
  0x5f   : > { %v202_v7 = vadd.f32 %v201_v6, %v200_v5  ;;  %p442_p1 = pnand %p441_p0, %p435_p5 }
  0x61   : > { %v203_v8 = vrot.slane %v202_v7, 1 }
  0x63   : > { %v204_v9 = vadd.f32 %v203_v8, %v202_v7 }
  0x65   : > { %205 = vst [vmem:[%s194_s29] sm:$0x1] %v204_v9 }
  0x66   : > { %445 = shalt.err (!%p442_p1)
}
  0x67   : > { %s446_s25 = scalar_lea.hbm %s690_s16, 16  ;;  %s450_s5 = scalar_lea.hbm %s734_s2, 32 }
  0x68   : > { %p447_p11 = scmp.ne.s32.totalorder %s690_s16, %s446_s25  ;;  %p451_p4 = scmp.lt.u32.totalorder %s690_s16, %s734_s2 }
  0x69   : > { %p452_p10 = scmp.lt.u32.totalorder %s450_s5, %s446_s25  ;;  %p454_p6 = scmp.lt.u32.totalorder %s446_s25, %s690_s16 }
  0x6a   : > { %p448_p12 = pnand %p447_p11, %p747_p13 }
  0x6b   : > { %p453_p3 = por %p452_p10, %p451_p4 }
  0x6c   : > { %p449_p2 = pneg %p448_p12 }
  0x6d   : > { %p455_p7 = por %p454_p6, %p453_p3 }
  0x6f   : > { %p456_p5 = pnand %p455_p7, %p449_p2 }
  0x71   : > { %459 = shalt.err (!%p456_p5)
}
  0x72   : > { %325 = dma.vmem_to_hbm [thread:$0]  (%p747_p13), %s685_s14, 16, %s690_s16, %s207_s24  }
  0x73 PF: > { %s231_s30 = sand.u32 1, %s490_s9   ;;  %p748_p8 = scmp.ne.s32.totalorder %s740_s22, 0 }
  0x74   : > { %p749_p9 = scmp.ge.s32.totalorder %s502_s12, 2  ;;  %s232_s3 = scalar_lea.sflag [#allocation4], %s231_s30 }
  0x76   : > { %p335_p0 = pnand %p749_p9, %p748_p8 }
  0x78   : > { %485 = dma.done.wait (!%p335_p0), %s232_s3, 16  }
  0x79   : > { %487 = vsyncadd (!%p335_p0), %s232_s3, 4294967280  ;;  %p18_p1 = scmp.ge.s32.totalorder %s547_s15, 4   ;;  %s750_s9 = smov %s494_s10 }
  0x7a   : > { %s751_s10 = smov %s498_s11  ;;  %s752_s11 = smov %s559_s18 }
  0x7b   : > { %s753_s12 = smov %s547_s15  ;;  %20 = sbr.rel (!%p18_p1) target bundleno = 7 (0x7), region = 86 }
  0x82   :  { %236 = vsyncpa [#allocation3], 1 }
  0x83   :  { %238 = vsyncpa [#allocation3 + $0x1], 1 }
  0x84   :  { %239 = vsyncpa [#allocation6], 1 }
  0x85   :  { %241 = vsyncpa [#allocation6 + $0x1], 1 }
  0x86   :  { %242 = vsyncpa [#allocation4], 1 }
  0x87   :  { %244 = vsyncpa [#allocation4 + $0x1], 1 }

</bundles_post_ra>
